<compile_context>
chip_gen: v5e
topology: v5e:2x2
jax: 0.10.0
libtpu: 0.0.40
codegen_flags: <defaults>
</compile_context>

<pallas_src>
import functools

import jax
import jax.numpy as jnp
from jax import lax
from jax.experimental import pallas as pl
from jax.experimental.pallas import tpu as pltpu

_D_PAD = 128  # lane-dense padded width for hidden / output feature dims


def _round_up(x: int, m: int) -> int:
    return ((x + m - 1) // m) * m


def _mlp_fused_kernel(x_ref, w_ref, b_ref, o_ref, *,
                      num_layers: int, in_feats: int, sub_rows: int):
    """One row tile of the whole MLP, sub-tiled over rows.

    x_ref: (tm, in_feats) f32/bf16  input activations (real feature width)
    w_ref: (L, D, D)      bf16      all layer weights, zero-padded
    b_ref: (L, 1, D)      f32       all layer biases, zero-padded
    o_ref: (tm, D)        bf16      final-layer output (padded cols)
    """
    n_sub = o_ref.shape[0] // sub_rows

    def compute(row0):
        h = x_ref[pl.ds(row0, sub_rows), :].astype(jnp.bfloat16)
        for l in range(num_layers):                 # static unroll: L is small
            # Layer 0 only sees the real K rows; padded rows/cols are zero.
            w = w_ref[l, :in_feats, :] if l == 0 else w_ref[l]
            acc = jnp.dot(h, w, preferred_element_type=jnp.float32)
            acc = acc + b_ref[l]                    # (1, D) f32 bias, VPU add
            if l != num_layers - 1:
                h = jnp.maximum(acc, 0.0).astype(jnp.bfloat16)   # ReLU -> bf16
            else:
                o_ref[pl.ds(row0, sub_rows), :] = acc.astype(o_ref.dtype)

    if n_sub == 1:
        compute(0)
    else:
        def body(s, carry):
            compute(pl.multiple_of(s * sub_rows, sub_rows))
            return carry
        lax.fori_loop(0, n_sub, body, 0, unroll=True)


def init_mlp_params(key, in_feats, n_hidden, n_classes, n_layers):
    """nn.Linear-style init: U(-1/sqrt(fan_in), 1/sqrt(fan_in)). Returns [(W,b)]."""
    dims = [in_feats] + [n_hidden] * n_layers + [n_classes]
    params = []
    for i in range(len(dims) - 1):
        key, kw, kb = jax.random.split(key, 3)
        fan_in, fan_out = dims[i], dims[i + 1]
        bound = 1.0 / jnp.sqrt(fan_in)
        W = jax.random.uniform(kw, (fan_in, fan_out), jnp.float32, -bound, bound)
        bvec = jax.random.uniform(kb, (fan_out,), jnp.float32, -bound, bound)
        params.append((W, bvec))
    return params


def pack_mlp_params(params):
    """One-time zero-pad + stack of (W [K,N], b [N]) into kernel operands."""
    D = _D_PAD
    dims = [params[0][0].shape[0]] + [W.shape[1] for W, _ in params]
    assert max(dims) <= D, (
        "feature dims > 128 need the K/N-tiled path (not implemented)")
    w_list, b_list = [], []
    for W, b in params:
        k, n = W.shape
        Wp = jnp.zeros((D, D), jnp.bfloat16).at[:k, :n].set(W.astype(jnp.bfloat16))
        bp = jnp.zeros((1, D), jnp.float32).at[0, :n].set(b.astype(jnp.float32))
        w_list.append(Wp)
        b_list.append(bp)
    return jnp.stack(w_list), jnp.stack(b_list)   # [L,D,D] bf16, [L,1,D] f32


def _pick_row_tile(M: int) -> int:
    if M < 128:
        return max(16, _round_up(M, 16))           # one program, minimal pad
    if M >= 2048:
        return 512                                 # >=4 tiles; sub-tiled inside
    # guarantee a grid extent >= 2 so both v7x TensorCores get work
    return min(256, _round_up((M + 1) // 2, 16))


def mlp_forward_pallas(x, w_stack, b_stack, n_classes):
    """x: [M, in_feats] float; w_stack/b_stack from pack_mlp_params."""
    M, in_feats = x.shape
    L = w_stack.shape[0]
    D = _D_PAD

    tm = _pick_row_tile(M)
    sub_rows = min(tm, 256)
    n_tiles = pl.cdiv(M, tm)
    M_pad = n_tiles * tm

    # Feature dim is never padded to 128; only round K to a sublane multiple
    # (no-op for typical dims) and pad rows when M isn't a tile multiple.
    Kx = max(8, _round_up(in_feats, 8))
    if M_pad == M and Kx == in_feats:
        x_in = x                                   # zero wrapper passes over x
    else:
        x_in = jnp.zeros((M_pad, Kx), jnp.bfloat16).at[:M, :in_feats].set(
            x.astype(jnp.bfloat16))

    kernel = functools.partial(_mlp_fused_kernel, num_layers=L,
                               in_feats=Kx, sub_rows=sub_rows)

    out_pad = pl.pallas_call(
        kernel,
        out_shape=jax.ShapeDtypeStruct((M_pad, D), jnp.bfloat16),
        grid_spec=pltpu.PrefetchScalarGridSpec(
            num_scalar_prefetch=0,
            grid=(n_tiles,),
            in_specs=[
                pl.BlockSpec((tm, Kx), lambda i: (i, 0)),       # activation rows
                pl.BlockSpec((L, D, D), lambda i: (0, 0, 0)),   # weights, resident
                pl.BlockSpec((L, 1, D), lambda i: (0, 0, 0)),   # biases, resident
            ],
            out_specs=pl.BlockSpec((tm, D), lambda i: (i, 0)),
        ),
        compiler_params=pltpu.CompilerParams(
            dimension_semantics=("parallel",),
            vmem_limit_bytes=32 * 1024 * 1024,
        ),
    )(x_in, w_stack, b_stack)

    return out_pad[:M, :n_classes].astype(jnp.float32)


if __name__ == "__main__":
    # Config consistent with the module:
    #   in_feats=32, n_hidden=64, n_classes=16, n_layers=2,
    #   activation=ReLU, dropout (inference => identity)
    in_feats, n_hidden, n_classes, n_layers = 32, 64, 16, 2
    batch = 8

    key = jax.random.PRNGKey(0)
    key, kx = jax.random.split(key)
    x = jax.random.normal(kx, (batch, in_feats), jnp.float32)

    params = init_mlp_params(key, in_feats, n_hidden, n_classes, n_layers)
    w_stack, b_stack = pack_mlp_params(params)      # once at init, not per call

    out = mlp_forward_pallas(x, w_stack, b_stack, n_classes)
    out = jax.block_until_ready(out)

    # Plain-JAX f32 reference (bf16 matmul path => relaxed tolerance).
    ref = x
    for i, (W, b) in enumerate(params):
        ref = ref @ W + b
        if i != len(params) - 1:
            ref = jnp.maximum(ref, 0.0)

    assert out.shape == (batch, n_classes)
    max_err = float(jnp.max(jnp.abs(out - ref)))
    assert jnp.allclose(out, ref, atol=5e-2, rtol=5e-2), f"max_err={max_err}"

    print("KERNEL_OK")
</pallas_src>

<mosaic_0001>
module attributes {stable_mosaic.version = 11 : i64} {
  func.func @_mlp_fused_kernel(%arg0: i32, %arg1: memref<16x32xbf16, #tpu.memory_space<vmem>>, %arg2: memref<3x128x128xbf16, #tpu.memory_space<vmem>>, %arg3: memref<3x1x128xf32, #tpu.memory_space<vmem>>, %arg4: memref<16x128xbf16, #tpu.memory_space<vmem>>) attributes {dimension_semantics = [#tpu.dimension_semantics<parallel>], iteration_bounds = array<i64: 1>, scalar_prefetch = 0 : i64, scratch_operands = 0 : i64, tpu.core_type = #tpu.core_type<tc>, window_params = [{transform_indices = @transform_0, window_bounds = array<i64: 16, 32>}, {pipeline_mode = #tpu.pipeline_mode<synchronous>, transform_indices = @transform_1, window_bounds = array<i64: 3, 128, 128>}, {pipeline_mode = #tpu.pipeline_mode<synchronous>, transform_indices = @transform_2, window_bounds = array<i64: 3, 1, 128>}, {transform_indices = @transform_3, window_bounds = array<i64: 16, 128>}]} {
    %c0 = arith.constant 0 : index
    %c0_0 = arith.constant 0 : index
    %0 = vector.load %arg1[%c0, %c0_0] : memref<16x32xbf16, #tpu.memory_space<vmem>>, vector<16x32xbf16>
    %c0_1 = arith.constant 0 : index
    %c0_2 = arith.constant 0 : index
    %c0_3 = arith.constant 0 : index
    %1 = vector.load %arg2[%c0_1, %c0_2, %c0_3] : memref<3x128x128xbf16, #tpu.memory_space<vmem>>, vector<1x32x128xbf16>
    %2 = vector.shape_cast %1 : vector<1x32x128xbf16> to vector<32x128xbf16>
    %cst = arith.constant dense<0.000000e+00> : vector<16x128xf32>
    %3 = tpu.matmul %0, %2, %cst {dimension_numbers = #tpu.dot_dimension_numbers<[1], [0], [0], [1], [0, 0, 1, 1], [], []>} : vector<16x32xbf16>, vector<32x128xbf16>, vector<16x128xf32> -> vector<16x128xf32>
    %c0_4 = arith.constant 0 : index
    %c0_5 = arith.constant 0 : index
    %c0_6 = arith.constant 0 : index
    %4 = vector.load %arg3[%c0_4, %c0_5, %c0_6] : memref<3x1x128xf32, #tpu.memory_space<vmem>>, vector<1x1x128xf32>
    %5 = vector.shape_cast %4 : vector<1x1x128xf32> to vector<1x128xf32>
    %6 = vector.broadcast %5 : vector<1x128xf32> to vector<16x128xf32>
    %7 = arith.addf %3, %6 : vector<16x128xf32>
    %cst_7 = arith.constant 0.000000e+00 : f32
    %8 = vector.broadcast %cst_7 : f32 to vector<16x128xf32>
    %9 = arith.maximumf %7, %8 : vector<16x128xf32>
    %10 = arith.truncf %9 : vector<16x128xf32> to vector<16x128xbf16>
    %c1 = arith.constant 1 : index
    %c0_8 = arith.constant 0 : index
    %c0_9 = arith.constant 0 : index
    %11 = vector.load %arg2[%c1, %c0_8, %c0_9] : memref<3x128x128xbf16, #tpu.memory_space<vmem>>, vector<1x128x128xbf16>
    %12 = vector.shape_cast %11 : vector<1x128x128xbf16> to vector<128x128xbf16>
    %cst_10 = arith.constant dense<0.000000e+00> : vector<16x128xf32>
    %13 = tpu.matmul %10, %12, %cst_10 {dimension_numbers = #tpu.dot_dimension_numbers<[1], [0], [0], [1], [0, 0, 1, 1], [], []>} : vector<16x128xbf16>, vector<128x128xbf16>, vector<16x128xf32> -> vector<16x128xf32>
    %c1_11 = arith.constant 1 : index
    %c0_12 = arith.constant 0 : index
    %c0_13 = arith.constant 0 : index
    %14 = vector.load %arg3[%c1_11, %c0_12, %c0_13] : memref<3x1x128xf32, #tpu.memory_space<vmem>>, vector<1x1x128xf32>
    %15 = vector.shape_cast %14 : vector<1x1x128xf32> to vector<1x128xf32>
    %16 = vector.broadcast %15 : vector<1x128xf32> to vector<16x128xf32>
    %17 = arith.addf %13, %16 : vector<16x128xf32>
    %cst_14 = arith.constant 0.000000e+00 : f32
    %18 = vector.broadcast %cst_14 : f32 to vector<16x128xf32>
    %19 = arith.maximumf %17, %18 : vector<16x128xf32>
    %20 = arith.truncf %19 : vector<16x128xf32> to vector<16x128xbf16>
    %c2 = arith.constant 2 : index
    %c0_15 = arith.constant 0 : index
    %c0_16 = arith.constant 0 : index
    %21 = vector.load %arg2[%c2, %c0_15, %c0_16] : memref<3x128x128xbf16, #tpu.memory_space<vmem>>, vector<1x128x128xbf16>
    %22 = vector.shape_cast %21 : vector<1x128x128xbf16> to vector<128x128xbf16>
    %cst_17 = arith.constant dense<0.000000e+00> : vector<16x128xf32>
    %23 = tpu.matmul %20, %22, %cst_17 {dimension_numbers = #tpu.dot_dimension_numbers<[1], [0], [0], [1], [0, 0, 1, 1], [], []>} : vector<16x128xbf16>, vector<128x128xbf16>, vector<16x128xf32> -> vector<16x128xf32>
    %c2_18 = arith.constant 2 : index
    %c0_19 = arith.constant 0 : index
    %c0_20 = arith.constant 0 : index
    %24 = vector.load %arg3[%c2_18, %c0_19, %c0_20] : memref<3x1x128xf32, #tpu.memory_space<vmem>>, vector<1x1x128xf32>
    %25 = vector.shape_cast %24 : vector<1x1x128xf32> to vector<1x128xf32>
    %26 = vector.broadcast %25 : vector<1x128xf32> to vector<16x128xf32>
    %27 = arith.addf %23, %26 : vector<16x128xf32>
    %28 = arith.truncf %27 : vector<16x128xf32> to vector<16x128xbf16>
    %c0_21 = arith.constant 0 : index
    %c0_22 = arith.constant 0 : index
    %29 = vector.load %arg4[%c0_21, %c0_22] : memref<16x128xbf16, #tpu.memory_space<vmem>>, vector<16x128xbf16>
    tpu.vector_store %arg4[%c0_21, %c0_22], %28 {strides = array<i32>} : memref<16x128xbf16, #tpu.memory_space<vmem>>, vector<16x128xbf16>,
    return
  }
  func.func @transform_0(%arg0: i32) -> (i32, i32) {
    %c0_i32 = arith.constant 0 : i32
    %c0_i32_0 = arith.constant 0 : i32
    return %arg0, %c0_i32 : i32, i32
  }
  func.func @transform_1(%arg0: i32) -> (i32, i32, i32) {
    %c0_i32 = arith.constant 0 : i32
    %c0_i32_0 = arith.constant 0 : i32
    %c0_i32_1 = arith.constant 0 : i32
    %c0_i32_2 = arith.constant 0 : i32
    return %c0_i32, %c0_i32_0, %c0_i32_1 : i32, i32, i32
  }
  func.func @transform_2(%arg0: i32) -> (i32, i32, i32) {
    %c0_i32 = arith.constant 0 : i32
    %c0_i32_0 = arith.constant 0 : i32
    %c0_i32_1 = arith.constant 0 : i32
    %c0_i32_2 = arith.constant 0 : i32
    return %c0_i32, %c0_i32_0, %c0_i32_1 : i32, i32, i32
  }
  func.func @transform_3(%arg0: i32) -> (i32, i32) {
    %c0_i32 = arith.constant 0 : i32
    %c0_i32_0 = arith.constant 0 : i32
    return %arg0, %c0_i32 : i32, i32
  }
}

</mosaic_0001>

<bundles_post_ra>
// kernel: tpu_custom_call.1
= control target key start
LH: loop header
LB: loop body
LE: loop exit
PB: predicated region body
PF: predicated region fallthrough
CT: control target
= control target key end

     0   :  { %8 = vsyncpa [#allocation3], 0  ;;  %s569_s0 = inlined_call_operand.hbm [shape: bf16[16,32], index: 0, kind: input, shape index: {}]   ;;  %s570_s1 = inlined_call_operand.hbm [shape: bf16[3,128,128], index: 1, kind: input, shape index: {}]   ;;  %s571_s2 = inlined_call_operand.hbm [shape: f32[3,1,128], index: 2, kind: input, shape index: {}]   ;;  %s572_s3 = inlined_call_operand.hbm [shape: bf16[16,128], index: 3, kind: output, shape index: {}]  }
   0x1   :  { %9 = vsyncpa [#allocation6], 0 }
   0x2   :  { %10 = vsyncpa [#allocation4], 0  ;;  %s28_s14 = sshll.u32 %s570_s1, 4  ;;  %s520_s15 = smov [#allocation5]   ;;  %s29_s14 = int_to_ptr.hbm [resolvable:$true] %s28_s14 }
   0x3   :  { %s30_s16 = sshll.u32 %s520_s15, 4  ;;  %s15_s19 = sshll.u32 %s569_s0, 4  ;;  %s31_s16 = int_to_ptr.vmem [resolvable:$true] %s30_s16  ;;  %s16_s19 = int_to_ptr.hbm [resolvable:$true] %s15_s19 }
   0x4   :  { %s521_s20 = smov 64   ;;  %s522_s21 = smov 4  }
   0x5   :  { %36 = dma.hbm_to_vmem [thread:$0]  %s29_s14, 3072, %s31_s16, [#allocation6], %s521_s20, %s521_s20, %s522_s21  }
   0x6   :  { %s523_s22 = smov [#allocation2]   ;;  %s41_s1 = sshll.u32 %s571_s2, 4  ;;  %s42_s1 = int_to_ptr.hbm [resolvable:$true] %s41_s1 }
   0x7   :  { %s17_s23 = sshll.u32 %s523_s22, 4  ;;  %s524_s0 = smov [#allocation7]   ;;  %s18_s23 = int_to_ptr.vmem [resolvable:$true] %s17_s23 }
   0x8   :  { %23 = dma.hbm_to_vmem [thread:$0]  %s16_s19, 128, %s18_s23, [#allocation3], %s521_s20, %s521_s20, %s522_s21  }
   0x9   :  { %s43_s26 = sshll.u32 %s524_s0, 4  ;;  %s525_s27 = smov 16   ;;  %s44_s26 = int_to_ptr.vmem [resolvable:$true] %s43_s26 }
   0xa   :  { %s526_s28 = smov 1  }
   0xb   :  { %49 = dma.hbm_to_vmem [thread:$0]  %s42_s1, 48, %s44_s26, [#allocation6], %s525_s27, %s525_s27, %s526_s28  }
   0xc   :  { %514 = dma.done.wait [#allocation3], 128  }
   0xd   :  { %515 = vsyncadd [#allocation3], 4294967168 }
   0xe   :  { %516 = dma.done.wait [#allocation6], 3120  }
   0xf   :  { %517 = vsyncadd [#allocation6], 4294964176  ;;  %v385_v0 = vld [vmem:[#allocation5 + $0x8] sm:$0xff]  ;;  %v393_v1 = vld [vmem:[#allocation5 + $0x78] sm:$0xff]  ;;  %vm90_vm0 = vcmask 261120   ;;  %s527_s2 = smov [#allocation8]  }
  0x10   :  { %100 = vmatpush.bf16.msra.mxu0 %v385_v0  ;;  %v384_v2 = vld [vmem:[#allocation5] sm:$0xff]  ;;  %181 = vmatpush.bf16.msra.mxu1 %v393_v1  ;;  %v392_v3 = vld [vmem:[#allocation5 + $0x70] sm:$0xff]  ;;  %v383_v4 = vld [vmem:[#allocation2] sm:$0xff]  ;;  %s290_s29 = sshll.u32 %s527_s2, 4  ;;  %s292_s5 = sshll.u32 %s572_s3, 4  ;;  %s291_s29 = int_to_ptr.vmem [resolvable:$true] %s290_s29  ;;  %s293_s5 = int_to_ptr.hbm [resolvable:$true] %s292_s5 }
  0x11   :  { %v391_v5 = vld [vmem:[#allocation5 + $0x68] sm:$0xff]  ;;  %v390_v6 = vld [vmem:[#allocation5 + $0x60] sm:$0xff]  ;;  %v389_v7 = vld [vmem:[#allocation5 + $0x58] sm:$0xff] }
  0x12   :  { %v388_v8 = vld [vmem:[#allocation5 + $0x50] sm:$0xff]  ;;  %v387_v9 = vld [vmem:[#allocation5 + $0x48] sm:$0xff]  ;;  %v386_v10 = vld [vmem:[#allocation5 + $0x40] sm:$0xff] }
  0x13   :  { %v401_v11 = vld [vmem:[#allocation5 + $0xb8] sm:$0xff]  ;;  %v400_v12 = vld [vmem:[#allocation5 + $0xb0] sm:$0xff]  ;;  %v399_v13 = vld [vmem:[#allocation5 + $0xa8] sm:$0xff] }
  0x14   :  { %101 = vmatpush.bf16.msra.mxu0 %v384_v2  ;;  %182 = vmatpush.bf16.msra.mxu1 %v392_v3  ;;  %v398_v14 = vld [vmem:[#allocation5 + $0xa0] sm:$0xff]  ;;  %v397_v23 = vld [vmem:[#allocation5 + $0x98] sm:$0xff]  ;;  %v396_v24 = vld [vmem:[#allocation5 + $0x90] sm:$0xff] }
  0x15   :  { %268 = vmatpush.bf16.msra.mxu2 %v401_v11  ;;  %v415_v16 = vld [vmem:[#allocation7] ss:$0 sm:$0xff]  ;;  %v395_v25 = vld [vmem:[#allocation5 + $0x88] sm:$0xff]  ;;  %v416_v28 = vld [vmem:[#allocation7 + $0x1] ss:$0 sm:$0xff] }
  0x16   :  { %v394_v26 = vld [vmem:[#allocation5 + $0x80] sm:$0xff] }
  0x17   :  { %318 = vmatmul.msk.bf16.vlgmr.msra.gmra.mxu0 %vm90_vm0, %v383_v4  ;;  %v417_v36 = vld [vmem:[#allocation7 + $0x2] ss:$0 sm:$0xff] }
  0x18   :  { %183 = vmatpush.bf16.msra.mxu1 %v391_v5 }
  0x19   :  { %269 = vmatpush.bf16.msra.mxu2 %v400_v12 }
  0x1c   :  { %184 = vmatpush.bf16.msra.mxu1 %v390_v6 }
  0x1d   :  { %270 = vmatpush.bf16.msra.mxu2 %v399_v13 }
  0x20   :  { %185 = vmatpush.bf16.msra.mxu1 %v389_v7 }
  0x21   :  { %271 = vmatpush.bf16.msra.mxu2 %v398_v14 }
  0x24   :  { %186 = vmatpush.bf16.msra.mxu1 %v388_v8 }
  0x25   :  { %272 = vmatpush.bf16.msra.mxu2 %v397_v23 }
  0x28   :  { %187 = vmatpush.bf16.msra.mxu1 %v387_v9 }
  0x29   :  { %273 = vmatpush.bf16.msra.mxu2 %v396_v24 }
  0x2c   :  { %188 = vmatpush.bf16.msra.mxu1 %v386_v10 }
  0x2d   :  { %274 = vmatpush.bf16.msra.mxu2 %v395_v25 }
  0x31   :  { %275 = vmatpush.bf16.msra.mxu2 %v394_v26 }
  0x94   :  { %v103_v15 = vpop.f32.mrf.mxu0 }
  0x95   :  { %v104_v17 = vadd.f32 %v415_v16, %v103_v15 }
  0x97   :  { %v108_v20 = vmax.f32 %v104_v17, 0.0 }
  0x9c   :  { %v105_v18 = vpop.f32.mrf.mxu0 }
  0x9d   :  { %v106_v19 = vadd.f32 %v415_v16, %v105_v18 }
  0x9f   :  { %v109_v21 = vmax.f32 %v106_v19, 0.0 }
  0xa1   :  { %v110_v22 = vpack.c.bf16 %v109_v21, %v108_v20 }
  0xa3   :  { %189 = vmatmul.bf16.vlgmr.msra.gmra.mxu1 %v110_v22 }
 0x120   :  { %v190_v27 = vpop.f32.mrf.mxu1 }
 0x121   :  { %v191_v29 = vadd.f32 %v416_v28, %v190_v27 }
 0x123   :  { %v195_v32 = vmax.f32 %v191_v29, 0.0 }
 0x128   :  { %v192_v30 = vpop.f32.mrf.mxu1 }
 0x129   :  { %v193_v31 = vadd.f32 %v416_v28, %v192_v30 }
 0x12b   :  { %v196_v33 = vmax.f32 %v193_v31, 0.0 }
 0x12d   :  { %v197_v34 = vpack.c.bf16 %v196_v33, %v195_v32 }
 0x12f   :  { %276 = vmatmul.bf16.vlgmr.msra.gmra.mxu2 %v197_v34 }
 0x1b2   :  { %v277_v35 = vpop.f32.mrf.mxu2 }
 0x1b3   :  { %v278_v38 = vadd.f32 %v417_v36, %v277_v35 }
 0x1ba   :  { %v279_v37 = vpop.f32.mrf.mxu2 }
 0x1bb   :  { %v280_v39 = vadd.f32 %v417_v36, %v279_v37 }
 0x1bd   :  { %v405_v40 = vpack.c.bf16 %v280_v39, %v278_v38 }
 0x1bf   :  { %406 = vst [vmem:[#allocation8] sm:$0xff] %v405_v40  }
 0x1c0   :  { %298 = dma.vmem_to_hbm [thread:$0]  %s291_s29, 128, %s293_s5, [#allocation4], %s521_s20, %s521_s20, %s522_s21  }
 0x1c1   :  { %518 = dma.done.wait [#allocation4], 128  }
 0x1c2   :  { %519 = vsyncadd [#allocation4], 4294967168 }
 0x1c3   :  { %303 = vsyncpa [#allocation3], 1 }
 0x1c4   :  { %304 = vsyncpa [#allocation6], 1 }
 0x1c5   :  { %305 = vsyncpa [#allocation4], 1 }

</bundles_post_ra>
